<compile_context>
chip_gen: v5e
topology: v5e:2x2
jax: 0.10.0
libtpu: 0.0.40
codegen_flags: <defaults>
</compile_context>

<pallas_src>
import functools

import jax
import jax.numpy as jnp
from jax.experimental import pallas as pl
from jax.experimental.pallas import tpu as pltpu


def _lane_roll(x, shift):
    """Rotate along the last (lane) axis with a non-negative static amount (XLU op)."""
    n = x.shape[-1]
    return pltpu.roll(x, shift % n, x.ndim - 1)


# ---------------------------------------------------------------------------
# Fused kernel: one image per grid step, channel-major (C, H*W) layout in VMEM.
# ---------------------------------------------------------------------------
def fused_bottleneck_kernel(x_ref, s1_ref, b1_ref, w1_ref, b2_ref, w2_ref,
                            o_ref, *, H, W, last):
    """
    x_ref : (1, C, HW)    input image (NCHW flattened over space -> pure reshape)
    s1_ref: (C, 1)        folded bn1 scale       b1_ref: (C, 1)   folded bn1 shift
    w1_ref: (IC, C)       1x1 conv weight with bn2 scale folded in (bf16)
    b2_ref: (IC, 1)       folded bn2 shift
    w2_ref: (9, G, IC)    3x3 conv weight, leading index = kh*3 + kw (bf16)
    o_ref : (1, C+G, HW)  rows [:C] = x passthrough, rows [C:] = conv2 output
            (or (1, G, HW) when last=True)
    """
    HW = H * W
    C = x_ref.shape[1]
    mdt = w1_ref.dtype                                          # matmul operand dtype (bf16)

    x = x_ref[0]                                                # (C, HW), f32
    # bn1 + relu: lane-dense VPU work, per-channel scale/shift broadcast along lanes.
    a = jnp.maximum(x * s1_ref[...] + b1_ref[...], 0.0)

    # 1x1 conv (+ folded bn2 scale) on the MXU: (IC, C) @ (C, HW) -> (IC, HW), f32 accumulate.
    mid = jnp.dot(w1_ref[...], a.astype(mdt), preferred_element_type=jnp.float32)
    mid = jnp.maximum(mid + b2_ref[...], 0.0)                   # bn2 shift + relu

    # ----- 3x3 conv, padding=1, no padded buffer / misaligned slices / patches tensor -----
    lane = jax.lax.broadcasted_iota(jnp.int32, (1, HW), 1)      # flat pixel index
    col = lane % W                                              # output column index

    mid_c = mid.astype(mdt)
    # Column (w) neighbours: one lane rotation + one mask each (kw = 0 and kw = 2 taps).
    mid_l = jnp.where(col >= 1, _lane_roll(mid, 1), 0.0).astype(mdt)       # value at (h, w-1)
    mid_r = jnp.where(col < W - 1, _lane_roll(mid, -1), 0.0).astype(mdt)   # value at (h, w+1)
    taps = (mid_l, mid_c, mid_r)                                # kw = 0, 1, 2

    # Per-kernel-row partial sums: 9 accumulating (G, IC) @ (IC, HW) MXU dots, f32 accumulate.
    def kernel_row(kh):
        acc = jnp.dot(w2_ref[3 * kh + 0], taps[0], preferred_element_type=jnp.float32)
        acc = acc + jnp.dot(w2_ref[3 * kh + 1], taps[1], preferred_element_type=jnp.float32)
        acc = acc + jnp.dot(w2_ref[3 * kh + 2], taps[2], preferred_element_type=jnp.float32)
        return acc                                              # (G, HW)

    part_top, part_mid, part_bot = kernel_row(0), kernel_row(1), kernel_row(2)

    # Row (h) shifts commute with the channel contraction, so rotate the small (G, HW) partials
    # (not nine (IC, HW) taps) and mask the wrapped top/bottom rows.
    y = part_mid
    y = y + jnp.where(lane >= W, _lane_roll(part_top, W), 0.0)       # input row h-1 (h == 0 masked)
    y = y + jnp.where(lane < HW - W, _lane_roll(part_bot, -W), 0.0)  # input row h+1 (h == H-1 masked)

    # Fused torch.cat((x, out), 1): two direct sub-range stores, no concat relayout.
    if last:
        o_ref[0] = y.astype(o_ref.dtype)
    else:
        G = y.shape[0]
        o_ref[0, 0:C, :] = x.astype(o_ref.dtype)
        o_ref[0, C:C + G, :] = y.astype(o_ref.dtype)


# ---------------------------------------------------------------------------
# Parameter folding (eval-mode BN) and wrapper
# ---------------------------------------------------------------------------
def _fold_params(params, matmul_dtype=jnp.bfloat16, eps=1e-5):
    s1 = params["bn1_gamma"] / jnp.sqrt(params["bn1_var"] + eps)
    b1 = params["bn1_beta"] - params["bn1_mean"] * s1
    s2 = params["bn2_gamma"] / jnp.sqrt(params["bn2_var"] + eps)
    b2 = params["bn2_beta"] - params["bn2_mean"] * s2

    # 1x1 weight (IC, C, 1, 1) -> (IC, C); fold bn2 scale onto the output channels (exact).
    w1 = params["conv1_w"][:, :, 0, 0].astype(jnp.float32) * s2[:, None].astype(jnp.float32)

    # 3x3 weight (G, IC, 3, 3) -> (kh, kw, G, IC) -> (9, G, IC), leading index = kh*3 + kw.
    G, IC = params["conv2_w"].shape[:2]
    w2 = jnp.transpose(params["conv2_w"], (2, 3, 0, 1)).reshape(9, G, IC)

    return (s1.astype(jnp.float32).reshape(-1, 1),
            b1.astype(jnp.float32).reshape(-1, 1),
            w1.astype(matmul_dtype),
            b2.astype(jnp.float32).reshape(-1, 1),
            w2.astype(matmul_dtype))


def bottleneck_forward(x_nchw, params, last=False, matmul_dtype=jnp.bfloat16):
    """NCHW-in / NCHW-out fused Bottleneck.forward(x, last); boundary is a reshape only."""
    N, C, H, W = x_nchw.shape
    HW = H * W
    s1, b1, w1, b2, w2 = _fold_params(params, matmul_dtype)
    IC, G = w1.shape[0], w2.shape[1]
    C_out = G if last else C + G

    x_flat = x_nchw.reshape(N, C, HW).astype(jnp.float32)
    kernel = functools.partial(fused_bottleneck_kernel, H=H, W=W, last=last)

    out_flat = pl.pallas_call(
        kernel,
        out_shape=jax.ShapeDtypeStruct((N, C_out, HW), jnp.float32),
        grid_spec=pltpu.PrefetchScalarGridSpec(
            num_scalar_prefetch=0,
            grid=(N,),
            in_specs=[
                pl.BlockSpec((1, C, HW), lambda n: (n, 0, 0)),
                pl.BlockSpec((C, 1), lambda n: (0, 0)),
                pl.BlockSpec((C, 1), lambda n: (0, 0)),
                pl.BlockSpec((IC, C), lambda n: (0, 0)),
                pl.BlockSpec((IC, 1), lambda n: (0, 0)),
                pl.BlockSpec((9, G, IC), lambda n: (0, 0, 0)),
            ],
            out_specs=pl.BlockSpec((1, C_out, HW), lambda n: (n, 0, 0)),
        ),
        compiler_params=pltpu.CompilerParams(
            dimension_semantics=("parallel",),
            vmem_limit_bytes=32 * 1024 * 1024,
        ),
    )(x_flat, s1, b1, w1, b2, w2)

    return out_flat.reshape(N, C_out, H, W)


# ---------------------------------------------------------------------------
# Pure-JAX reference (PyTorch semantics, correctness check only)
# ---------------------------------------------------------------------------
def bottleneck_reference(x, params, last=False):
    eps = 1e-5
    s1 = params["bn1_gamma"] / jnp.sqrt(params["bn1_var"] + eps)
    b1 = params["bn1_beta"] - params["bn1_mean"] * s1
    a = jnp.maximum(x * s1[None, :, None, None] + b1[None, :, None, None], 0.0)
    t = jax.lax.conv_general_dilated(
        a, params["conv1_w"], (1, 1), "VALID",
        dimension_numbers=("NCHW", "OIHW", "NCHW"))
    s2 = params["bn2_gamma"] / jnp.sqrt(params["bn2_var"] + eps)
    b2 = params["bn2_beta"] - params["bn2_mean"] * s2
    u = jnp.maximum(t * s2[None, :, None, None] + b2[None, :, None, None], 0.0)
    o = jax.lax.conv_general_dilated(
        u, params["conv2_w"], (1, 1), "SAME",
        dimension_numbers=("NCHW", "OIHW", "NCHW"))
    if last:
        return o
    return jnp.concatenate((x, o), axis=1)


if __name__ == "__main__":
    # Small, sublane-aligned test shapes (the real Encoder uses growthRate = 64, H = W = 128).
    nChannels, growthRate = 8, 8
    interChannels = 4 * growthRate
    N, H, W = 2, 16, 16

    key = jax.random.PRNGKey(0)
    keys = jax.random.split(key, 11)

    params = {
        # BatchNorm2d(nChannels), eval-mode stats
        "bn1_gamma": 1.0 + 0.1 * jax.random.normal(keys[0], (nChannels,), jnp.float32),
        "bn1_beta": 0.1 * jax.random.normal(keys[1], (nChannels,), jnp.float32),
        "bn1_mean": 0.1 * jax.random.normal(keys[2], (nChannels,), jnp.float32),
        "bn1_var": jnp.abs(jax.random.normal(keys[3], (nChannels,), jnp.float32)) + 0.5,
        # Conv2d(nChannels, interChannels, 1, bias=False) -> (IC, C, 1, 1)
        "conv1_w": 0.1 * jax.random.normal(keys[4], (interChannels, nChannels, 1, 1), jnp.float32),
        # BatchNorm2d(interChannels)
        "bn2_gamma": 1.0 + 0.1 * jax.random.normal(keys[5], (interChannels,), jnp.float32),
        "bn2_beta": 0.1 * jax.random.normal(keys[6], (interChannels,), jnp.float32),
        "bn2_mean": 0.1 * jax.random.normal(keys[7], (interChannels,), jnp.float32),
        "bn2_var": jnp.abs(jax.random.normal(keys[8], (interChannels,), jnp.float32)) + 0.5,
        # Conv2d(interChannels, growthRate, 3, padding=1, bias=False) -> (G, IC, 3, 3)
        "conv2_w": 0.1 * jax.random.normal(keys[9], (growthRate, interChannels, 3, 3), jnp.float32),
    }

    x = jax.random.normal(keys[10], (N, nChannels, H, W), jnp.float32)

    # Tolerance sized for bf16 MXU operands (f32 accumulation) + the exact bn2-scale fold.
    ATOL = RTOL = 1e-2

    out = jax.block_until_ready(bottleneck_forward(x, params, last=False))
    ref = jax.block_until_ready(bottleneck_reference(x, params, last=False))
    assert out.shape == (N, nChannels + growthRate, H, W), out.shape
    assert jnp.allclose(out, ref, atol=ATOL, rtol=RTOL), float(jnp.max(jnp.abs(out - ref)))

    # also exercise the last=True path
    out_last = jax.block_until_ready(bottleneck_forward(x, params, last=True))
    ref_last = jax.block_until_ready(bottleneck_reference(x, params, last=True))
    assert out_last.shape == (N, growthRate, H, W), out_last.shape
    assert jnp.allclose(out_last, ref_last, atol=ATOL, rtol=RTOL), \
        float(jnp.max(jnp.abs(out_last - ref_last)))

    print("KERNEL_OK")
</pallas_src>

<mosaic_0001>
module attributes {stable_mosaic.version = 11 : i64} {
  func.func @fused_bottleneck_kernel(%arg0: i32, %arg1: memref<1x8x256xf32, #tpu.memory_space<vmem>>, %arg2: memref<8x1xf32, #tpu.memory_space<vmem>>, %arg3: memref<8x1xf32, #tpu.memory_space<vmem>>, %arg4: memref<32x8xbf16, #tpu.memory_space<vmem>>, %arg5: memref<32x1xf32, #tpu.memory_space<vmem>>, %arg6: memref<9x8x32xbf16, #tpu.memory_space<vmem>>, %arg7: memref<1x16x256xf32, #tpu.memory_space<vmem>>) attributes {dimension_semantics = [#tpu.dimension_semantics<parallel>], iteration_bounds = array<i64: 2>, scalar_prefetch = 0 : i64, scratch_operands = 0 : i64, tpu.core_type = #tpu.core_type<tc>, window_params = [{transform_indices = @transform_0, window_bounds = array<i64: 1, 8, 256>}, {pipeline_mode = #tpu.pipeline_mode<synchronous>, transform_indices = @transform_1, window_bounds = array<i64: 8, 1>}, {pipeline_mode = #tpu.pipeline_mode<synchronous>, transform_indices = @transform_2, window_bounds = array<i64: 8, 1>}, {pipeline_mode = #tpu.pipeline_mode<synchronous>, transform_indices = @transform_3, window_bounds = array<i64: 32, 8>}, {pipeline_mode = #tpu.pipeline_mode<synchronous>, transform_indices = @transform_4, window_bounds = array<i64: 32, 1>}, {pipeline_mode = #tpu.pipeline_mode<synchronous>, transform_indices = @transform_5, window_bounds = array<i64: 9, 8, 32>}, {transform_indices = @transform_6, window_bounds = array<i64: 1, 16, 256>}]} {
    %c0 = arith.constant 0 : index
    %c0_0 = arith.constant 0 : index
    %c0_1 = arith.constant 0 : index
    %0 = vector.load %arg1[%c0, %c0_0, %c0_1] : memref<1x8x256xf32, #tpu.memory_space<vmem>>, vector<1x8x256xf32>
    %1 = vector.shape_cast %0 : vector<1x8x256xf32> to vector<8x256xf32>
    %c0_2 = arith.constant 0 : index
    %c0_3 = arith.constant 0 : index
    %2 = vector.load %arg2[%c0_2, %c0_3] : memref<8x1xf32, #tpu.memory_space<vmem>>, vector<8x1xf32>
    %3 = vector.broadcast %2 : vector<8x1xf32> to vector<8x256xf32>
    %4 = arith.mulf %1, %3 : vector<8x256xf32>
    %c0_4 = arith.constant 0 : index
    %c0_5 = arith.constant 0 : index
    %5 = vector.load %arg3[%c0_4, %c0_5] : memref<8x1xf32, #tpu.memory_space<vmem>>, vector<8x1xf32>
    %6 = vector.broadcast %5 : vector<8x1xf32> to vector<8x256xf32>
    %7 = arith.addf %4, %6 : vector<8x256xf32>
    %cst = arith.constant 0.000000e+00 : f32
    %8 = vector.broadcast %cst : f32 to vector<8x256xf32>
    %9 = arith.maximumf %7, %8 : vector<8x256xf32>
    %c0_6 = arith.constant 0 : index
    %c0_7 = arith.constant 0 : index
    %10 = vector.load %arg4[%c0_6, %c0_7] : memref<32x8xbf16, #tpu.memory_space<vmem>>, vector<32x8xbf16>
    %11 = arith.truncf %9 : vector<8x256xf32> to vector<8x256xbf16>
    %cst_8 = arith.constant dense<0.000000e+00> : vector<32x256xf32>
    %12 = tpu.matmul %10, %11, %cst_8 {dimension_numbers = #tpu.dot_dimension_numbers<[1], [0], [0], [1], [0, 0, 1, 1], [], []>} : vector<32x8xbf16>, vector<8x256xbf16>, vector<32x256xf32> -> vector<32x256xf32>
    %c0_9 = arith.constant 0 : index
    %c0_10 = arith.constant 0 : index
    %13 = vector.load %arg5[%c0_9, %c0_10] : memref<32x1xf32, #tpu.memory_space<vmem>>, vector<32x1xf32>
    %14 = vector.broadcast %13 : vector<32x1xf32> to vector<32x256xf32>
    %15 = arith.addf %12, %14 : vector<32x256xf32>
    %cst_11 = arith.constant 0.000000e+00 : f32
    %16 = vector.broadcast %cst_11 : f32 to vector<32x256xf32>
    %17 = arith.maximumf %15, %16 : vector<32x256xf32>
    %18 = tpu.iota {dimensions = array<i32: 1>} : vector<1x256xi32>
    %c16_i32 = arith.constant 16 : i32
    %c0_i32 = arith.constant 0 : i32
    %19 = arith.cmpi eq, %c16_i32, %c0_i32 : i32
    %c1_i32 = arith.constant 1 : i32
    %20 = arith.select %19, %c1_i32, %c16_i32 : i32
    %21 = vector.broadcast %20 : i32 to vector<1x256xi32>
    %22 = arith.remsi %18, %21 : vector<1x256xi32>
    %c0_i32_12 = arith.constant 0 : i32
    %23 = vector.broadcast %c0_i32_12 : i32 to vector<1x256xi32>
    %24 = arith.cmpi ne, %22, %23 : vector<1x256xi32>
    %c0_i32_13 = arith.constant 0 : i32
    %25 = vector.broadcast %c0_i32_13 : i32 to vector<1x256xi32>
    %26 = arith.cmpi slt, %22, %25 : vector<1x256xi32>
    %c0_i32_14 = arith.constant 0 : i32
    %27 = arith.cmpi slt, %20, %c0_i32_14 : i32
    %28 = vector.broadcast %27 : i1 to vector<1x256xi1>
    %29 = vector.broadcast %28 : vector<1x256xi1> to vector<1x256xi1>
    %30 = arith.xori %26, %29 : vector<1x256xi1>
    %31 = arith.andi %30, %24 : vector<1x256xi1>
    %32 = vector.broadcast %20 : i32 to vector<1x256xi32>
    %33 = arith.addi %22, %32 : vector<1x256xi32>
    %34 = arith.select %31, %33, %22 : vector<1x256xi1>, vector<1x256xi32>
    %35 = arith.truncf %17 : vector<32x256xf32> to vector<32x256xbf16>
    %c1_i32_15 = arith.constant 1 : i32
    %36 = vector.broadcast %c1_i32_15 : i32 to vector<1x256xi32>
    %37 = arith.cmpi sge, %34, %36 : vector<1x256xi32>
    %c1_i32_16 = arith.constant 1 : i32
    %38 = tpu.dynamic_rotate %17 by %c1_i32_16 dim 1 : vector<32x256xf32>, i32 -> vector<32x256xf32>
    %cst_17 = arith.constant 0.000000e+00 : f32
    %39 = vector.shape_cast %37 : vector<1x256xi1> to vector<1x256xi1>
    %40 = vector.broadcast %39 : vector<1x256xi1> to vector<32x256xi1>
    %41 = vector.broadcast %cst_17 : f32 to vector<32x256xf32>
    %42 = arith.select %40, %38, %41 : vector<32x256xi1>, vector<32x256xf32>
    %43 = arith.truncf %42 : vector<32x256xf32> to vector<32x256xbf16>
    %c15_i32 = arith.constant 15 : i32
    %44 = vector.broadcast %c15_i32 : i32 to vector<1x256xi32>
    %45 = arith.cmpi slt, %34, %44 : vector<1x256xi32>
    %c255_i32 = arith.constant 255 : i32
    %46 = tpu.dynamic_rotate %17 by %c255_i32 dim 1 : vector<32x256xf32>, i32 -> vector<32x256xf32>
    %cst_18 = arith.constant 0.000000e+00 : f32
    %47 = vector.shape_cast %45 : vector<1x256xi1> to vector<1x256xi1>
    %48 = vector.broadcast %47 : vector<1x256xi1> to vector<32x256xi1>
    %49 = vector.broadcast %cst_18 : f32 to vector<32x256xf32>
    %50 = arith.select %48, %46, %49 : vector<32x256xi1>, vector<32x256xf32>
    %51 = arith.truncf %50 : vector<32x256xf32> to vector<32x256xbf16>
    %c0_19 = arith.constant 0 : index
    %c0_20 = arith.constant 0 : index
    %c0_21 = arith.constant 0 : index
    %52 = vector.load %arg6[%c0_19, %c0_20, %c0_21] : memref<9x8x32xbf16, #tpu.memory_space<vmem>>, vector<1x8x32xbf16>
    %53 = vector.shape_cast %52 : vector<1x8x32xbf16> to vector<8x32xbf16>
    %cst_22 = arith.constant dense<0.000000e+00> : vector<8x256xf32>
    %54 = tpu.matmul %53, %43, %cst_22 {dimension_numbers = #tpu.dot_dimension_numbers<[1], [0], [0], [1], [0, 0, 1, 1], [], []>} : vector<8x32xbf16>, vector<32x256xbf16>, vector<8x256xf32> -> vector<8x256xf32>
    %c1 = arith.constant 1 : index
    %c0_23 = arith.constant 0 : index
    %c0_24 = arith.constant 0 : index
    %55 = vector.load %arg6[%c1, %c0_23, %c0_24] : memref<9x8x32xbf16, #tpu.memory_space<vmem>>, vector<1x8x32xbf16>
    %56 = vector.shape_cast %55 : vector<1x8x32xbf16> to vector<8x32xbf16>
    %cst_25 = arith.constant dense<0.000000e+00> : vector<8x256xf32>
    %57 = tpu.matmul %56, %35, %cst_25 {dimension_numbers = #tpu.dot_dimension_numbers<[1], [0], [0], [1], [0, 0, 1, 1], [], []>} : vector<8x32xbf16>, vector<32x256xbf16>, vector<8x256xf32> -> vector<8x256xf32>
    %58 = arith.addf %54, %57 : vector<8x256xf32>
    %c2 = arith.constant 2 : index
    %c0_26 = arith.constant 0 : index
    %c0_27 = arith.constant 0 : index
    %59 = vector.load %arg6[%c2, %c0_26, %c0_27] : memref<9x8x32xbf16, #tpu.memory_space<vmem>>, vector<1x8x32xbf16>
    %60 = vector.shape_cast %59 : vector<1x8x32xbf16> to vector<8x32xbf16>
    %cst_28 = arith.constant dense<0.000000e+00> : vector<8x256xf32>
    %61 = tpu.matmul %60, %51, %cst_28 {dimension_numbers = #tpu.dot_dimension_numbers<[1], [0], [0], [1], [0, 0, 1, 1], [], []>} : vector<8x32xbf16>, vector<32x256xbf16>, vector<8x256xf32> -> vector<8x256xf32>
    %62 = arith.addf %58, %61 : vector<8x256xf32>
    %c3 = arith.constant 3 : index
    %c0_29 = arith.constant 0 : index
    %c0_30 = arith.constant 0 : index
    %63 = vector.load %arg6[%c3, %c0_29, %c0_30] : memref<9x8x32xbf16, #tpu.memory_space<vmem>>, vector<1x8x32xbf16>
    %64 = vector.shape_cast %63 : vector<1x8x32xbf16> to vector<8x32xbf16>
    %cst_31 = arith.constant dense<0.000000e+00> : vector<8x256xf32>
    %65 = tpu.matmul %64, %43, %cst_31 {dimension_numbers = #tpu.dot_dimension_numbers<[1], [0], [0], [1], [0, 0, 1, 1], [], []>} : vector<8x32xbf16>, vector<32x256xbf16>, vector<8x256xf32> -> vector<8x256xf32>
    %c4 = arith.constant 4 : index
    %c0_32 = arith.constant 0 : index
    %c0_33 = arith.constant 0 : index
    %66 = vector.load %arg6[%c4, %c0_32, %c0_33] : memref<9x8x32xbf16, #tpu.memory_space<vmem>>, vector<1x8x32xbf16>
    %67 = vector.shape_cast %66 : vector<1x8x32xbf16> to vector<8x32xbf16>
    %cst_34 = arith.constant dense<0.000000e+00> : vector<8x256xf32>
    %68 = tpu.matmul %67, %35, %cst_34 {dimension_numbers = #tpu.dot_dimension_numbers<[1], [0], [0], [1], [0, 0, 1, 1], [], []>} : vector<8x32xbf16>, vector<32x256xbf16>, vector<8x256xf32> -> vector<8x256xf32>
    %69 = arith.addf %65, %68 : vector<8x256xf32>
    %c5 = arith.constant 5 : index
    %c0_35 = arith.constant 0 : index
    %c0_36 = arith.constant 0 : index
    %70 = vector.load %arg6[%c5, %c0_35, %c0_36] : memref<9x8x32xbf16, #tpu.memory_space<vmem>>, vector<1x8x32xbf16>
    %71 = vector.shape_cast %70 : vector<1x8x32xbf16> to vector<8x32xbf16>
    %cst_37 = arith.constant dense<0.000000e+00> : vector<8x256xf32>
    %72 = tpu.matmul %71, %51, %cst_37 {dimension_numbers = #tpu.dot_dimension_numbers<[1], [0], [0], [1], [0, 0, 1, 1], [], []>} : vector<8x32xbf16>, vector<32x256xbf16>, vector<8x256xf32> -> vector<8x256xf32>
    %73 = arith.addf %69, %72 : vector<8x256xf32>
    %c6 = arith.constant 6 : index
    %c0_38 = arith.constant 0 : index
    %c0_39 = arith.constant 0 : index
    %74 = vector.load %arg6[%c6, %c0_38, %c0_39] : memref<9x8x32xbf16, #tpu.memory_space<vmem>>, vector<1x8x32xbf16>
    %75 = vector.shape_cast %74 : vector<1x8x32xbf16> to vector<8x32xbf16>
    %cst_40 = arith.constant dense<0.000000e+00> : vector<8x256xf32>
    %76 = tpu.matmul %75, %43, %cst_40 {dimension_numbers = #tpu.dot_dimension_numbers<[1], [0], [0], [1], [0, 0, 1, 1], [], []>} : vector<8x32xbf16>, vector<32x256xbf16>, vector<8x256xf32> -> vector<8x256xf32>
    %c7 = arith.constant 7 : index
    %c0_41 = arith.constant 0 : index
    %c0_42 = arith.constant 0 : index
    %77 = vector.load %arg6[%c7, %c0_41, %c0_42] : memref<9x8x32xbf16, #tpu.memory_space<vmem>>, vector<1x8x32xbf16>
    %78 = vector.shape_cast %77 : vector<1x8x32xbf16> to vector<8x32xbf16>
    %cst_43 = arith.constant dense<0.000000e+00> : vector<8x256xf32>
    %79 = tpu.matmul %78, %35, %cst_43 {dimension_numbers = #tpu.dot_dimension_numbers<[1], [0], [0], [1], [0, 0, 1, 1], [], []>} : vector<8x32xbf16>, vector<32x256xbf16>, vector<8x256xf32> -> vector<8x256xf32>
    %80 = arith.addf %76, %79 : vector<8x256xf32>
    %c8 = arith.constant 8 : index
    %c0_44 = arith.constant 0 : index
    %c0_45 = arith.constant 0 : index
    %81 = vector.load %arg6[%c8, %c0_44, %c0_45] : memref<9x8x32xbf16, #tpu.memory_space<vmem>>, vector<1x8x32xbf16>
    %82 = vector.shape_cast %81 : vector<1x8x32xbf16> to vector<8x32xbf16>
    %cst_46 = arith.constant dense<0.000000e+00> : vector<8x256xf32>
    %83 = tpu.matmul %82, %51, %cst_46 {dimension_numbers = #tpu.dot_dimension_numbers<[1], [0], [0], [1], [0, 0, 1, 1], [], []>} : vector<8x32xbf16>, vector<32x256xbf16>, vector<8x256xf32> -> vector<8x256xf32>
    %84 = arith.addf %80, %83 : vector<8x256xf32>
    %c16_i32_47 = arith.constant 16 : i32
    %85 = vector.broadcast %c16_i32_47 : i32 to vector<1x256xi32>
    %86 = arith.cmpi sge, %18, %85 : vector<1x256xi32>
    %c16_i32_48 = arith.constant 16 : i32
    %87 = tpu.dynamic_rotate %62 by %c16_i32_48 dim 1 : vector<8x256xf32>, i32 -> vector<8x256xf32>
    %cst_49 = arith.constant 0.000000e+00 : f32
    %88 = vector.shape_cast %86 : vector<1x256xi1> to vector<1x256xi1>
    %89 = vector.broadcast %88 : vector<1x256xi1> to vector<8x256xi1>
    %90 = vector.broadcast %cst_49 : f32 to vector<8x256xf32>
    %91 = arith.select %89, %87, %90 : vector<8x256xi1>, vector<8x256xf32>
    %92 = arith.addf %73, %91 : vector<8x256xf32>
    %c240_i32 = arith.constant 240 : i32
    %93 = vector.broadcast %c240_i32 : i32 to vector<1x256xi32>
    %94 = arith.cmpi slt, %18, %93 : vector<1x256xi32>
    %c240_i32_50 = arith.constant 240 : i32
    %95 = tpu.dynamic_rotate %84 by %c240_i32_50 dim 1 : vector<8x256xf32>, i32 -> vector<8x256xf32>
    %cst_51 = arith.constant 0.000000e+00 : f32
    %96 = vector.shape_cast %94 : vector<1x256xi1> to vector<1x256xi1>
    %97 = vector.broadcast %96 : vector<1x256xi1> to vector<8x256xi1>
    %98 = vector.broadcast %cst_51 : f32 to vector<8x256xf32>
    %99 = arith.select %97, %95, %98 : vector<8x256xi1>, vector<8x256xf32>
    %100 = arith.addf %92, %99 : vector<8x256xf32>
    %c0_52 = arith.constant 0 : index
    %c0_53 = arith.constant 0 : index
    %c0_54 = arith.constant 0 : index
    %101 = vector.load %arg7[%c0_52, %c0_53, %c0_54] : memref<1x16x256xf32, #tpu.memory_space<vmem>>, vector<1x8x256xf32>
    %102 = vector.shape_cast %101 : vector<1x8x256xf32> to vector<8x256xf32>
    %103 = vector.shape_cast %1 : vector<8x256xf32> to vector<1x8x256xf32>
    tpu.vector_store %arg7[%c0_52, %c0_53, %c0_54], %103 {strides = array<i32>} : memref<1x16x256xf32, #tpu.memory_space<vmem>>, vector<1x8x256xf32>,
    %c0_55 = arith.constant 0 : index
    %c8_56 = arith.constant 8 : index
    %c0_57 = arith.constant 0 : index
    %104 = vector.load %arg7[%c0_55, %c8_56, %c0_57] : memref<1x16x256xf32, #tpu.memory_space<vmem>>, vector<1x8x256xf32>
    %105 = vector.shape_cast %104 : vector<1x8x256xf32> to vector<8x256xf32>
    %106 = vector.shape_cast %100 : vector<8x256xf32> to vector<1x8x256xf32>
    tpu.vector_store %arg7[%c0_55, %c8_56, %c0_57], %106 {strides = array<i32>} : memref<1x16x256xf32, #tpu.memory_space<vmem>>, vector<1x8x256xf32>,
    return
  }
  func.func @transform_0(%arg0: i32) -> (i32, i32, i32) {
    %c0_i32 = arith.constant 0 : i32
    %c0_i32_0 = arith.constant 0 : i32
    %c0_i32_1 = arith.constant 0 : i32
    return %arg0, %c0_i32, %c0_i32_0 : i32, i32, i32
  }
  func.func @transform_1(%arg0: i32) -> (i32, i32) {
    %c0_i32 = arith.constant 0 : i32
    %c0_i32_0 = arith.constant 0 : i32
    %c0_i32_1 = arith.constant 0 : i32
    return %c0_i32, %c0_i32_0 : i32, i32
  }
  func.func @transform_2(%arg0: i32) -> (i32, i32) {
    %c0_i32 = arith.constant 0 : i32
    %c0_i32_0 = arith.constant 0 : i32
    %c0_i32_1 = arith.constant 0 : i32
    return %c0_i32, %c0_i32_0 : i32, i32
  }
  func.func @transform_3(%arg0: i32) -> (i32, i32) {
    %c0_i32 = arith.constant 0 : i32
    %c0_i32_0 = arith.constant 0 : i32
    %c0_i32_1 = arith.constant 0 : i32
    return %c0_i32, %c0_i32_0 : i32, i32
  }
  func.func @transform_4(%arg0: i32) -> (i32, i32) {
    %c0_i32 = arith.constant 0 : i32
    %c0_i32_0 = arith.constant 0 : i32
    %c0_i32_1 = arith.constant 0 : i32
    return %c0_i32, %c0_i32_0 : i32, i32
  }
  func.func @transform_5(%arg0: i32) -> (i32, i32, i32) {
    %c0_i32 = arith.constant 0 : i32
    %c0_i32_0 = arith.constant 0 : i32
    %c0_i32_1 = arith.constant 0 : i32
    %c0_i32_2 = arith.constant 0 : i32
    return %c0_i32, %c0_i32_0, %c0_i32_1 : i32, i32, i32
  }
  func.func @transform_6(%arg0: i32) -> (i32, i32, i32) {
    %c0_i32 = arith.constant 0 : i32
    %c0_i32_0 = arith.constant 0 : i32
    %c0_i32_1 = arith.constant 0 : i32
    return %arg0, %c0_i32, %c0_i32_0 : i32, i32, i32
  }
}

</mosaic_0001>

<bundles_post_ra>
// kernel: tpu_custom_call.1
= control target key start
LH: loop header
LB: loop body
LE: loop exit
PB: predicated region body
PF: predicated region fallthrough
CT: control target
= control target key end

     0   :  { %11 = vsyncpa [#allocation3], 0  ;;  %s1632_s0 = inlined_call_operand.hbm [shape: f32[2,8,256], index: 0, kind: input, shape index: {}]   ;;  %s1633_s1 = inlined_call_operand.vmem [shape: f32[8,1], index: 1, kind: input, shape index: {}]   ;;  %s1634_s2 = inlined_call_operand.vmem [shape: f32[8,1], index: 2, kind: input, shape index: {}]   ;;  %s1635_s3 = inlined_call_operand.vmem [shape: bf16[32,8], index: 3, kind: input, shape index: {}]   ;;  %s1636_s4 = inlined_call_operand.vmem [shape: f32[32,1], index: 4, kind: input, shape index: {}]   ;;  %s1637_s5 = inlined_call_operand.vmem [shape: bf16[9,8,32], index: 5, kind: input, shape index: {}]   ;;  %s1638_s6 = inlined_call_operand.hbm [shape: f32[2,16,256], index: 6, kind: output, shape index: {}]  }
   0x1   :  { %13 = vsyncpa [#allocation3 + $0x1], 0 }
   0x2   :  { %14 = vsyncpa [#allocation4], 0 }
   0x3   :  { %16 = vsyncpa [#allocation4 + $0x1], 0  ;;  %s1282_s21 = smov 0   ;;  %s1284_s22 = smov 0  }
   0x4   :  { %s1286_s23 = smov 0   ;;  %s1288_s24 = smov 0  }
   0x5 LB: > { %s1303_s25 = sadd.s32 4294967295, %s1239_s24   ;;  %s920_s26 = sadd.s32 4294967294, %s1239_s24   ;;  %s1239_s24 = sphi %s1288_s24, %s1656_s24   ;;  %s1235_s23 = sphi %s1286_s23, %s1655_s23   ;;  %s1231_s22 = sphi %s1284_s22, %s1654_s22   ;;  %s1227_s21 = sphi %s1282_s21, %s1653_s21  }
   0x6   : > { %s1307_s27 = sadd.s32 1, %s1239_s24   ;;  %s29_s28 = sadd.s32 1, %s1235_s23 }
   0x7   : > { %s26_s29 = ssub.s32 %s1239_s24, %s1307_s27  ;;  %p36_p0 = scmp.ne.s32.totalorder %s1235_s23, %s1231_s22 }
   0x8   : > { %p27_p1 = scmp.eq.s32.totalorder %s26_s29, 0  ;;  %p37_p2 = scmp.eq.s32.totalorder %s1239_s24, 0 }
   0x9   : > { %p42_p3 = scmp.ne.s32.totalorder %s1231_s22, %s1227_s21  ;;  %p43_p4 = scmp.eq.s32.totalorder %s1303_s25, 0 }
   0xa   : > { %s1319_s30 = scalar_select %p27_p1, %s1235_s23, %s29_s28  }
   0xb   : > { %p1321_p5 = por %p37_p2, %p36_p0  ;;  %p1325_p6 = por %p43_p4, %p42_p3 }
   0xc   : > { %p171_p7 = scmp.eq.s32.totalorder %s1303_s25, 1  ;;  %p177_p8 = scmp.eq.s32.totalorder %s920_s26, 1 }
   0xd   : > { %p1060_p10 = scmp.lt.s32.totalorder %s1239_s24, 2  ;;  %s212_s11 = sand.u32 1, %s1235_s23  }
   0xe   : > { %p1332_p11 = por %p171_p7, %p36_p0  ;;  %p1336_p12 = por %p177_p8, %p42_p3 }
   0xf   : > { %s1044_s12 = sshll.u32 %s1239_s24, 4  ;;  %s923_s13 = sshll.u32 %s212_s11, 4 }
  0x10   : > { %s221_s16 = scalar_lea.hbm %s1632_s0, %s1044_s12  ;;  %s216_s18 = scalar_lea.vmem [#allocation2], %s923_s13 }
  0x11   : > { %s223_s17 = sshll.u32 %s221_s16, 4  ;;  %s225_s19 = sshll.u32 %s216_s18, 4  ;;  %s224_s17 = int_to_ptr.hbm [resolvable:$true] %s223_s17  ;;  %s226_s19 = int_to_ptr.vmem [resolvable:$true] %s225_s19 }
  0x12   : > { %p1347_p13 = pnand %p1060_p10, %p1321_p5  ;;  %p926_p0 = scmp.ge.s32.totalorder %s1239_s24, 1 }
  0x13   : > { %p230_p1 = scmp.lt.s32.totalorder %s1239_s24, 3  ;;  %s213_s26 = scalar_lea.sflag [#allocation3], %s212_s11 }
  0x14   : > { %s1143_s28 = sshra.s32 %s224_s17, 4  ;;  %p1147_p3 = pneg %p1347_p13  ;;  %s1144_s28 = int_to_ptr.hbm [resolvable:$true] %s1143_s28 }
  0x15   : > { %s1145_s29 = scalar_lea.hbm %s1144_s28, 16  ;;  %s1150_s7 = scalar_lea.hbm %s1632_s0, 32 }
  0x16   : > { %p1146_p2 = scmp.ne.s32.totalorder %s1144_s28, %s1145_s29  ;;  %p1151_p5 = scmp.lt.s32.totalorder %s1144_s28, %s1632_s0 }
  0x17   : > { %p1152_p8 = scmp.lt.s32.totalorder %s1150_s7, %s1145_s29 }
  0x18   : > { %p1148_p4 = pnand %p1147_p3, %p1146_p2 }
  0x19   : > { %p1153_p10 = por %p1152_p8, %p1151_p5 }
  0x1a   : > { %p1149_p7 = pneg %p1148_p4 }
  0x1c   : > { %p1154_p9 = pnand %p1153_p10, %p1149_p7 }
  0x1e   : > { %1157 = shalt.err (!%p1154_p9)
}
  0x1f   : > { %1055 = dma.hbm_to_vmem [thread:$0]  (!%p1347_p13), %s224_s17, 256, %s226_s19, %s213_s26  }
  0x20   : > { %p231_p2 = pnand %p926_p0, %p230_p1 }
  0x21   : > { %s1368_s11 = sand.u32 (!%p231_p2), 1, %s1231_s22  }
  0x22   : > { %234 = sbr.rel (%p231_p2) target bundleno = 773 (0x305), region = 44  ;;  %s927_s16 = sshll.u32 (!%p231_p2), %s1368_s11, 4 }
  0x23   : > { %s237_s18 = scalar_lea.sflag (!%p231_p2), [#allocation3], %s1368_s11  ;;  %s240_s28 = scalar_lea.vmem (!%p231_p2), [#allocation2], %s927_s16 }
  0x27   : > { %1218 = dma.done.wait (%p1325_p6), %s237_s18, 256  }
  0x28   : > { %1220 = vsyncadd (%p1325_p6), %s237_s18, 4294967040  ;;  %v1241_v0 = vmov 0   ;;  %v273_v1 = vld [vmem:[%s1633_s1] sm:$0xff]  ;;  %s928_s29 = sshll.u32 %s1368_s11, 5  ;;  %v272_v4 = vld [vmem:[%s240_s28 + $0x8] sm:$0xff]  ;;  %vm338_vm0 = vcmask 1043456   ;;  %v391_v60 = vlaneseq }
  0x29   : > { %1100 = vset.pattern.permute.xlu0 %v1241_v0  ;;  %1101 = vset.pattern.permute.xlu1 %v1241_v0  ;;  %v281_v2 = vld [vmem:[%s1634_s2] sm:$0xff]  ;;  %s1383_s8 = scalar_lea.vmem [#allocation5], %s928_s29  ;;  %v299_v6 = vld [vmem:[%s1636_s4 + $0x10] sm:$0xff]  ;;  %v300_v13 = vld [vmem:[%s1636_s4 + $0x18] sm:$0xff]  ;;  %vm331_vm1 = vcmask 64512   ;;  %s1242_s29 = smov 1  }
  0x2a   : > { %1102 = vset.pattern.permute.xlu2 %v1241_v0  ;;  %276 = vperm.xlu0 %1100, %v273_v1   ;;  %v271_v3 = vld [vmem:[%s240_s28] sm:$0xff]  ;;  %828 = vst [vmem:[%s1383_s8 + $0x8] sm:$0xff] %v272_v4  ;;  %v298_v14 = vld [vmem:[%s1636_s4 + $0x8] sm:$0xff]  ;;  %s1243_s12 = smov 127   ;;  %vm511_vm2 = vcmask 261120   ;;  %v1426_v61 = vand.u32 127, %v391_v60 }
  0x2b   : > { %827 = vst [vmem:[%s1383_s8] sm:$0xff] %v271_v3  ;;  %v297_v7 = vld [vmem:[%s1636_s4] sm:$0xff]  ;;  %313 = vperm.xlu1 %1101, %v299_v6   ;;  %v1046_v22 = vld [vmem:[%s1635_s3 + $0x8] sm:$0xff]  ;;  %s1244_s18 = smov 16   ;;  %s1245_s28 = smov 112  }
  0x2c   : > { %303 = vperm.xlu2 %1102, %v297_v7   ;;  %v1045_v21 = vld [vmem:[%s1635_s3] sm:$0xff]  ;;  %v1429_v62 = vadd.s32 128, %v1426_v61  ;;  %v398_v63 = vand.u32 15, %v1426_v61  ;;  %vm440_vm4 = vcmp.lt.s32.totalorder %v1426_v61, 1  ;;  %vm483_vm8 = vcmp.lt.s32.totalorder %v1426_v61, 127  ;;  %s1047_s17 = sshll.u32 %s1303_s25, 5 }
  0x2d   : > { %v941_v59 = vld [vmem:[%s1637_s5 + $0x4] sm:$0xf]  ;;  %v1024_v60 = vld [vmem:[%s1637_s5 + $0x20] sm:$0xf]  ;;  %vm799_vm13 = vcmp.lt.s32.totalorder %v1426_v61, 16  ;;  %vm793_vm14 = vcmp.ge.s32.totalorder %v1426_v61, 16  ;;  %s843_s26 = scalar_lea.hbm %s1638_s6, %s1047_s17 }
  0x2e   : > { %v405_v1 = vand.u32 15, %v1429_v62  ;;  %vm422_vm3 = vcmp.ge.s32.totalorder %v398_v63, 1  ;;  %vm465_vm9 = vcmp.lt.s32.totalorder %v398_v63, 15  ;;  %vm816_vm15 = vcmp.lt.s32.totalorder %v1426_v61, 112  ;;  %s832_s25 = scalar_lea.sflag [#allocation4], %s1368_s11  ;;  %s1193_s16 = scalar_lea.hbm %s1638_s6, 64 }
  0x2f   : > { %vm1434_vm6 = vmpackc.low %vm422_vm3, %vm422_vm3 }
  0x30   : > { %vm423_vm5 = vcmp.ge.s32.totalorder %v405_v1, 1  ;;  %vm466_vm10 = vcmp.lt.s32.totalorder %v405_v1, 15  ;;  %vm1477_vm11 = vmpackc.low %vm465_vm9, %vm465_vm9 }
  0x31   : > { %vm1446_vm7 = vmpackc.low %vm423_vm5, %vm423_vm5 }
  0x32   : > { %284 = vperm.xlu0 %1100, %v281_v2   ;;  %vm1481_vm12 = vmpackc.low %vm466_vm10, %vm466_vm10 }
  0x33   : > { %318 = vperm.xlu1 %1101, %v300_v13  }
  0x34   : > { %308 = vperm.xlu2 %1102, %v298_v14  }
  0x86   : > { %v304_v23 = vpop.permute.xlu2 %303 }
  0x8e   : > { %v309_v26 = vpop.permute.xlu2 %308 }
  0x9c   : > { %v277_v5 = vpop.permute.xlu0 %276 }
  0x9d   : > { %v279_v8 = vmul.f32 %v277_v5, %v271_v3  ;;  %v280_v9 = vmul.f32 %v277_v5, %v272_v4  ;;  %v314_v33 = vpop.permute.xlu1 %313 }
  0xa4   : > { %v285_v10 = vpop.permute.xlu0 %284 }
  0xa5   : > { %v287_v11 = vadd.f32 %v285_v10, %v279_v8  ;;  %v288_v12 = vadd.f32 %v285_v10, %v280_v9  ;;  %v319_v37 = vpop.permute.xlu1 %318 }
  0xa7   : > { %v289_v15 = vmax.f32 %v287_v11, 0.0  ;;  %v290_v16 = vmax.f32 %v288_v12, 0.0 }
  0xa9   : > { %v295_v17 = vpack.c.bf16 %v289_v15, %v289_v15  ;;  %v296_v18 = vpack.c.bf16 %v290_v16, %v290_v16 }
  0xab   : > { %v340_v19 = vsel %vm338_vm0, %v295_v17, 0  ;;  %v343_v20 = vsel %vm338_vm0, %v296_v18, 0  ;;  %vm811_vm0 = vcmp.lt.s32.totalorder %v1429_v62, 240 }
  0xac   : > { %352 = vmatpush.bf16.msra.mxu0 %v340_v19  ;;  %371 = vmatpush.bf16.msra.mxu1 %v343_v20 }
  0xaf   : > { %937 = vmatmul.msk.bf16.vlgmr.msra.gmra.mxu0 %vm331_vm1, %v1045_v21  ;;  %939 = vmatmul.msk.bf16.vlgmr.msra.gmra.mxu1 %vm331_vm1, %v1045_v21 }
  0xbf   : > { %938 = vmatmul.msk.bf16.gmra.mxu0 %vm331_vm1, %v1046_v22  ;;  %940 = vmatmul.msk.bf16.gmra.mxu1 %vm331_vm1, %v1046_v22 }
 0x12c   : > { %v354_v24 = vpop.f32.mrf.mxu0  ;;  %v373_v25 = vpop.f32.mrf.mxu1 }
 0x12d   : > { %v355_v27 = vadd.f32 %v354_v24, %v304_v23  ;;  %v374_v45 = vadd.f32 %v373_v25, %v304_v23 }
 0x12f   : > { %v383_v31 = vmax.f32 %v355_v27, 0.0  ;;  %v384_v55 = vmax.f32 %v374_v45, 0.0 }
 0x134   : > { %v356_v28 = vpop.f32.mrf.mxu0  ;;  %v375_v29 = vpop.f32.mrf.mxu1 }
 0x135   : > { %v357_v30 = vadd.f32 %v356_v28, %v309_v26  ;;  %v376_v40 = vadd.f32 %v375_v29, %v309_v26 }
 0x137   : > { %v385_v32 = vmax.f32 %v357_v30, 0.0  ;;  %v386_v50 = vmax.f32 %v376_v40, 0.0 }
 0x139   : > { %v1103_v34 = vpack.i.bf16 %v385_v32, %v383_v31  ;;  %v1414_v56 = vpack.c.bf16 %v386_v50, %v384_v55  ;;  %v1416_v57 = vpack.c.bf16 %v385_v32, %v383_v31  ;;  %v1113_v58 = vpack.i.bf16 %v386_v50, %v384_v55 }
 0x13b   : > { %1104 = vrot.lane.b32.xlu2 %v1103_v34, %s1242_s29 }
 0x13c   : > { %v359_v35 = vpop.f32.mrf.mxu0  ;;  %v378_v36 = vpop.f32.mrf.mxu1 }
 0x13d   : > { %v360_v38 = vadd.f32 %v359_v35, %v314_v33  ;;  %v379_v39 = vadd.f32 %v378_v36, %v314_v33 }
 0x13f   : > { %v387_v46 = vmax.f32 %v360_v38, 0.0  ;;  %v388_v47 = vmax.f32 %v379_v39, 0.0 }
 0x144   : > { %v361_v41 = vpop.f32.mrf.mxu0  ;;  %v380_v42 = vpop.f32.mrf.mxu1 }
 0x145   : > { %v362_v43 = vadd.f32 %v361_v41, %v319_v37  ;;  %v381_v44 = vadd.f32 %v380_v42, %v319_v37  ;;  %v508_v41 = vld [vmem:[%s1637_s5] sm:$0xf] }
 0x147   : > { %v389_v48 = vmax.f32 %v362_v43, 0.0  ;;  %v390_v49 = vmax.f32 %v381_v44, 0.0 }
 0x149   : > { %v1118_v51 = vpack.i.bf16 %v390_v49, %v388_v47  ;;  %v1406_v52 = vpack.c.bf16 %v390_v49, %v388_v47  ;;  %v1108_v53 = vpack.i.bf16 %v389_v48, %v387_v46  ;;  %v1408_v54 = vpack.c.bf16 %v389_v48, %v387_v46 }
 0x14b   : > { %1119 = vrot.lane.b32.xlu1 %v1118_v51, %s1242_s29  ;;  %534 = vmatpush.bf16.msra.mxu3 %v1406_v52 }
 0x14c   : > { %1109 = vrot.lane.b32.xlu0 %v1108_v53, %s1242_s29  ;;  %521 = vmatpush.bf16.msra.mxu2 %v1408_v54 }
 0x14d   : > { %1129 = vrot.lane.b32.xlu2 %v1118_v51, %s1243_s12 }
 0x14f   : > { %535 = vmatpush.bf16.msra.mxu3 %v1414_v56 }
 0x150   : > { %522 = vmatpush.bf16.msra.mxu2 %v1416_v57 }
 0x152   : > { %943 = vmatmul.msk.bf16.vlgmr.msra.gmra.mxu3 %vm511_vm2, %v941_v59 }
 0x153   : > { %1124 = vrot.lane.b32.xlu1 %v1108_v53, %s1243_s12  ;;  %942 = vmatmul.msk.bf16.vlgmr.msra.gmra.mxu2 %vm511_vm2, %v941_v59  ;;  %v974_v59 = vld [vmem:[%s1637_s5 + $0x10] sm:$0xf] }
 0x154   : > { %1114 = vrot.lane.b32.xlu0 %v1113_v58, %s1242_s29  ;;  %s844_s29 = sshll.u32 %s1383_s8, 4  ;;  %s845_s29 = int_to_ptr.vmem [resolvable:$true] %s844_s29 }
 0x15b   : > { %1139 = vrot.lane.b32.xlu1 %v1113_v58, %s1243_s12  ;;  %v958_v58 = vld [vmem:[%s1637_s5 + $0x8] sm:$0xf] }
 0x15c   : > { %1134 = vrot.lane.b32.xlu0 %v1103_v34, %s1243_s12  ;;  %s846_s12 = sshll.u32 %s843_s26, 4  ;;  %s847_s12 = int_to_ptr.hbm [resolvable:$true] %s846_s12 }
 0x15d   : > { %s1187_s13 = sshra.s32 %s847_s12, 4  ;;  %s1188_s13 = int_to_ptr.hbm [resolvable:$true] %s1187_s13 }
 0x15e   : > { %s1189_s7 = scalar_lea.hbm %s1188_s13, 32  ;;  %p1194_p0 = scmp.lt.s32.totalorder %s1188_s13, %s1638_s6 }
 0x15f   : > { %p1190_p6 = scmp.ne.s32.totalorder %s1188_s13, %s1189_s7  ;;  %p1195_p1 = scmp.lt.s32.totalorder %s1193_s16, %s1189_s7 }
 0x161   : > { %p1191_p9 = pnand %p1190_p6, %p1332_p11  ;;  %p1196_p3 = por %p1195_p1, %p1194_p0 }
 0x163   : > { %p1192_p13 = pneg %p1191_p9 }
 0x165   : > { %p1197_p4 = pnand %p1196_p3, %p1192_p13 }
 0x195   : > { %v1105_v0 = vpop.permute.xlu2 %1104 }
 0x196   : > { %v1107_v17 = vunpack.i.h.bf16 %v1105_v0  ;;  %v1106_v24 = vunpack.i.l.bf16 %v1105_v0 }
 0x1a7   : > { %v1130_v14 = vpop.permute.xlu2 %1129 }
 0x1a8   : > { %v1132_v18 = vunpack.i.h.bf16 %v1130_v14  ;;  %v1131_v20 = vunpack.i.l.bf16 %v1130_v14 }
 0x1bd   : > { %v1120_v2 = vpop.permute.xlu1 %1119 }
 0x1be   : > { %v1122_v3 = vunpack.i.h.bf16 %v1120_v2  ;;  %v1121_v4 = vunpack.i.l.bf16 %v1120_v2  ;;  %v1110_v5 = vpop.permute.xlu0 %1109 }
 0x1bf   : > { %v1112_v6 = vunpack.i.h.bf16 %v1110_v5  ;;  %v1111_v7 = vunpack.i.l.bf16 %v1110_v5 }
 0x1c1   : > { %v447_v9 = vsel %vm440_vm4, %v1121_v4, %v1111_v7  ;;  %v448_v10 = vsel %vm440_vm4, %v1122_v3, %v1112_v6  ;;  %v443_v11 = vsel %vm440_vm4, %v1111_v7, %v1121_v4  ;;  %v444_v12 = vsel %vm440_vm4, %v1112_v6, %v1122_v3 }
 0x1c2   : > { %v1450_v15 = vpack.c.bf16 %v448_v10, %v447_v9  ;;  %v1452_v16 = vpack.c.bf16 %v444_v12, %v443_v11 }
 0x1c4   : > { %946 = vmatpush.bf16.msk.msrb.mxu2 %vm1434_vm6, %v1450_v15  ;;  %953 = vmatpush.bf16.msk.msrb.mxu3 %vm1446_vm7, %v1452_v16 }
 0x1c5   : > { %v1125_v19 = vpop.permute.xlu1 %1124 }
 0x1c6   : > { %v1127_v21 = vunpack.i.h.bf16 %v1125_v19  ;;  %v1126_v22 = vunpack.i.l.bf16 %v1125_v19  ;;  %v1115_v23 = vpop.permute.xlu0 %1114 }
 0x1c7   : > { %v1117_v25 = vunpack.i.h.bf16 %v1115_v23  ;;  %v1116_v26 = vunpack.i.l.bf16 %v1115_v23 }
 0x1c8   : > { %v486_v27 = vsel %vm483_vm8, %v1126_v22, %v1131_v20  ;;  %v487_v28 = vsel %vm483_vm8, %v1127_v21, %v1132_v18  ;;  %v490_v29 = vsel %vm483_vm8, %v1131_v20, %v1126_v22  ;;  %v491_v30 = vsel %vm483_vm8, %v1132_v18, %v1127_v21 }
 0x1c9   : > { %v445_v31 = vsel %vm440_vm4, %v1116_v26, %v1106_v24  ;;  %v446_v32 = vsel %vm440_vm4, %v1117_v25, %v1107_v17  ;;  %v441_v33 = vsel %vm440_vm4, %v1106_v24, %v1116_v26  ;;  %v442_v34 = vsel %vm440_vm4, %v1107_v17, %v1117_v25 }
 0x1ca   : > { %v948_v36 = vpack.c.bf16 %v446_v32, %v445_v31  ;;  %v955_v37 = vpack.c.bf16 %v442_v34, %v441_v33  ;;  %v960_v38 = vpack.c.bf16 %v487_v28, %v486_v27  ;;  %v967_v40 = vpack.c.bf16 %v491_v30, %v490_v29 }
 0x1cc   : > { %949 = vmatpush.bf16.msk.msrb.mxu2 %vm1434_vm6, %v948_v36  ;;  %956 = vmatpush.bf16.msk.msrb.mxu3 %vm1446_vm7, %v955_v37 }
 0x1cd   : > { %961 = vmatpush.bf16.msk.msrb.mxu0 %vm1477_vm11, %v960_v38  ;;  %968 = vmatpush.bf16.msk.msrb.mxu1 %vm1481_vm12, %v967_v40  ;;  %v1140_v42 = vpop.permute.xlu1 %1139 }
 0x1ce   : > { %v1142_v43 = vunpack.i.h.bf16 %v1140_v42  ;;  %v1141_v44 = vunpack.i.l.bf16 %v1140_v42  ;;  %v1135_v45 = vpop.permute.xlu0 %1134 }
 0x1cf   : > { %v1137_v46 = vunpack.i.h.bf16 %v1135_v45  ;;  %v1136_v47 = vunpack.i.l.bf16 %v1135_v45  ;;  %950 = vmatmul.msk.bf16.vlgmr.msrb.gmra.mxu2 %vm511_vm2, %v508_v41  ;;  %957 = vmatmul.msk.bf16.vlgmr.msrb.gmra.mxu3 %vm511_vm2, %v508_v41 }
 0x1d0   : > { %616 = vmatpush.bf16.msra.mxu2 %v1408_v54  ;;  %629 = vmatpush.bf16.msra.mxu3 %v1406_v52 }
 0x1d1   : > { %v484_v48 = vsel %vm483_vm8, %v1136_v47, %v1141_v44  ;;  %v485_v49 = vsel %vm483_vm8, %v1137_v46, %v1142_v43  ;;  %v488_v50 = vsel %vm483_vm8, %v1141_v44, %v1136_v47  ;;  %v489_v51 = vsel %vm483_vm8, %v1142_v43, %v1137_v46 }
 0x1d2   : > { %v963_v53 = vpack.c.bf16 %v485_v49, %v484_v48  ;;  %v970_v55 = vpack.c.bf16 %v489_v51, %v488_v50 }
 0x1d4   : > { %617 = vmatpush.bf16.msra.mxu2 %v1416_v57  ;;  %630 = vmatpush.bf16.msra.mxu3 %v1414_v56 }
 0x1d5   : > { %964 = vmatpush.bf16.msk.msrb.mxu0 %vm1477_vm11, %v963_v53  ;;  %971 = vmatpush.bf16.msk.msrb.mxu1 %vm1481_vm12, %v970_v55  ;;  %v537_v0 = vpop.f32.mrf.mxu3 }
 0x1d6   : > { %v524_v63 = vpop.f32.mrf.mxu2 }
 0x1d8   : > { %994 = vmatpush.bf16.msk.msrb.mxu2 %vm1477_vm11, %v960_v38  ;;  %1001 = vmatpush.bf16.msk.msrb.mxu3 %vm1481_vm12, %v967_v40 }
 0x1d9   : > { %979 = vmatpush.bf16.msk.msra.mxu0 %vm1434_vm6, %v1450_v15  ;;  %986 = vmatpush.bf16.msk.msra.mxu1 %vm1446_vm7, %v1452_v16 }
 0x1da   : > { %965 = vmatmul.msk.bf16.vlgmr.msrb.gmra.mxu0 %vm511_vm2, %v958_v58  ;;  %972 = vmatmul.msk.bf16.vlgmr.msrb.gmra.mxu1 %vm511_vm2, %v958_v58 }
 0x1dc   : > { %997 = vmatpush.bf16.msk.msrb.mxu2 %vm1477_vm11, %v963_v53  ;;  %1004 = vmatpush.bf16.msk.msrb.mxu3 %vm1481_vm12, %v970_v55 }
 0x1dd   : > { %982 = vmatpush.bf16.msk.msra.mxu0 %vm1434_vm6, %v948_v36  ;;  %989 = vmatpush.bf16.msk.msra.mxu1 %vm1446_vm7, %v955_v37  ;;  %v539_v2 = vpop.f32.mrf.mxu3 }
 0x1de   : > { %v526_v1 = vpop.f32.mrf.mxu2 }
 0x1df   : > { %975 = vmatmul.msk.bf16.vlgmr.msra.gmra.mxu2 %vm511_vm2, %v974_v59  ;;  %976 = vmatmul.msk.bf16.vlgmr.msra.gmra.mxu3 %vm511_vm2, %v974_v59 }
 0x1e0   : > { %1012 = vmatpush.bf16.msk.msra.mxu2 %vm1434_vm6, %v1450_v15  ;;  %1019 = vmatpush.bf16.msk.msra.mxu3 %vm1446_vm7, %v1452_v16 }
 0x1e1   : > { %711 = vmatpush.bf16.msrb.mxu0 %v1408_v54  ;;  %724 = vmatpush.bf16.msrb.mxu1 %v1406_v52  ;;  %v973_v52 = vld [vmem:[%s1637_s5 + $0xc] sm:$0xf]  ;;  %v991_v54 = vld [vmem:[%s1637_s5 + $0x14] sm:$0xf] }
 0x1e4   : > { %1015 = vmatpush.bf16.msk.msra.mxu2 %vm1434_vm6, %v948_v36  ;;  %1022 = vmatpush.bf16.msk.msra.mxu3 %vm1446_vm7, %v955_v37 }
 0x1e5   : > { %712 = vmatpush.bf16.msrb.mxu0 %v1416_v57  ;;  %725 = vmatpush.bf16.msrb.mxu1 %v1414_v56  ;;  %v1007_v56 = vld [vmem:[%s1637_s5 + $0x1c] sm:$0xf]  ;;  %v1006_v57 = vld [vmem:[%s1637_s5 + $0x18] sm:$0xf] }
 0x1ea   : > { %983 = vmatmul.msk.bf16.vlgmr.msra.gmra.mxu0 %vm511_vm2, %v973_v52  ;;  %990 = vmatmul.msk.bf16.vlgmr.msra.gmra.mxu1 %vm511_vm2, %v973_v52 }
 0x1eb   : > { %1027 = vmatpush.bf16.msk.msra.mxu0 %vm1477_vm11, %v960_v38  ;;  %1034 = vmatpush.bf16.msk.msra.mxu1 %vm1481_vm12, %v967_v40 }
 0x1ef   : > { %1030 = vmatpush.bf16.msk.msra.mxu0 %vm1477_vm11, %v963_v53  ;;  %1037 = vmatpush.bf16.msk.msra.mxu1 %vm1481_vm12, %v970_v55 }
 0x1f0   : > { %998 = vmatmul.msk.bf16.vlgmr.msrb.gmra.mxu2 %vm511_vm2, %v991_v54  ;;  %1005 = vmatmul.msk.bf16.vlgmr.msrb.gmra.mxu3 %vm511_vm2, %v991_v54 }
 0x1fa   : > { %1008 = vmatmul.msk.bf16.vlgmr.msrb.gmra.mxu0 %vm511_vm2, %v1007_v56  ;;  %1009 = vmatmul.msk.bf16.vlgmr.msrb.gmra.mxu1 %vm511_vm2, %v1007_v56 }
 0x200   : > { %1016 = vmatmul.msk.bf16.vlgmr.msra.gmra.mxu2 %vm511_vm2, %v1006_v57  ;;  %1023 = vmatmul.msk.bf16.vlgmr.msra.gmra.mxu3 %vm511_vm2, %v1006_v57 }
 0x20a   : > { %1031 = vmatmul.msk.bf16.vlgmr.msra.gmra.mxu0 %vm511_vm2, %v1024_v60  ;;  %1038 = vmatmul.msk.bf16.vlgmr.msra.gmra.mxu1 %vm511_vm2, %v1024_v60 }
 0x252   : > { %v553_v3 = vpop.f32.mrf.mxu2  ;;  %v566_v4 = vpop.f32.mrf.mxu3 }
 0x253   : > { %v554_v5 = vadd.f32 %v553_v3, %v524_v63  ;;  %v567_v6 = vadd.f32 %v566_v4, %v537_v0 }
 0x257   : > { %v584_v7 = vpop.f32.mrf.mxu0  ;;  %v597_v8 = vpop.f32.mrf.mxu1 }
 0x258   : > { %v601_v9 = vadd.f32 %v584_v7, %v554_v5  ;;  %v602_v10 = vadd.f32 %v597_v8, %v567_v6 }
 0x25a   : > { %797 = vrot.lane.b32.xlu0 %v602_v10, %s1244_s18  ;;  %795 = vrot.lane.b32.xlu2 %v601_v9, %s1244_s18  ;;  %v555_v11 = vpop.f32.mrf.mxu2  ;;  %v568_v12 = vpop.f32.mrf.mxu3 }
 0x25f   : > { %v586_v13 = vpop.f32.mrf.mxu0  ;;  %v599_v14 = vpop.f32.mrf.mxu1 }
 0x262   : > { %v619_v15 = vpop.f32.mrf.mxu2  ;;  %v632_v16 = vpop.f32.mrf.mxu3 }
 0x267   : > { %v648_v17 = vpop.f32.mrf.mxu0  ;;  %v661_v18 = vpop.f32.mrf.mxu1 }
 0x268   : > { %v649_v19 = vadd.f32 %v648_v17, %v619_v15  ;;  %v662_v20 = vadd.f32 %v661_v18, %v632_v16 }
 0x26a   : > { %v621_v21 = vpop.f32.mrf.mxu2  ;;  %v634_v22 = vpop.f32.mrf.mxu3 }
 0x26f   : > { %v650_v23 = vpop.f32.mrf.mxu0  ;;  %v663_v24 = vpop.f32.mrf.mxu1 }
 0x273   : > { %v679_v25 = vpop.f32.mrf.mxu2  ;;  %v692_v26 = vpop.f32.mrf.mxu3 }
 0x274   : > { %v696_v27 = vadd.f32 %v679_v25, %v649_v19  ;;  %v697_v28 = vadd.f32 %v692_v26, %v662_v20 }
 0x277   : > { %v714_v29 = vpop.f32.mrf.mxu0  ;;  %v727_v30 = vpop.f32.mrf.mxu1 }
 0x27b   : > { %v681_v31 = vpop.f32.mrf.mxu2  ;;  %v694_v32 = vpop.f32.mrf.mxu3 }
 0x27f   : > { %v716_v33 = vpop.f32.mrf.mxu0  ;;  %v729_v34 = vpop.f32.mrf.mxu1 }
 0x283   : > { %v743_v35 = vpop.f32.mrf.mxu2  ;;  %v756_v36 = vpop.f32.mrf.mxu3 }
 0x284   : > { %v744_v37 = vadd.f32 %v743_v35, %v714_v29  ;;  %v757_v38 = vadd.f32 %v756_v36, %v727_v30 }
 0x287   : > { %v774_v39 = vpop.f32.mrf.mxu0  ;;  %v787_v40 = vpop.f32.mrf.mxu1 }
 0x288   : > { %v791_v41 = vadd.f32 %v774_v39, %v744_v37  ;;  %v792_v42 = vadd.f32 %v787_v40, %v757_v38 }
 0x28a   : > { %812 = vrot.lane.b32.xlu1 %v791_v41, %s1245_s28  ;;  %814 = vrot.lane.b32.xlu2 %v792_v42, %s1245_s28 }
 0x28b   : > { %v745_v43 = vpop.f32.mrf.mxu2  ;;  %v758_v44 = vpop.f32.mrf.mxu3 }
 0x28f   : > { %v776_v45 = vpop.f32.mrf.mxu0  ;;  %v789_v46 = vpop.f32.mrf.mxu1 }
 0x2b4   : > { %v796_v48 = vpop.permute.xlu2 %795 }
 0x2cc   : > { %v798_v47 = vpop.permute.xlu0 %797 }
 0x2cd   : > { %v801_v49 = vsel %vm799_vm13, %v798_v47, %v796_v48  ;;  %v800_v51 = vsel %vm799_vm13, %v796_v48, %v798_v47 }
 0x2ce   : > { %v806_v50 = vsel %vm793_vm14, %v801_v49, 0.0  ;;  %v809_v59 = vadd.f32 %v800_v51, %v697_v28 }
 0x2cf   : > { %v808_v53 = vadd.f32 %v806_v50, %v696_v27 }
 0x2e4   : > { %v815_v58 = vpop.permute.xlu2 %814 }
 0x2fc   : > { %v813_v55 = vpop.permute.xlu1 %812 }
 0x2fd   : > { %v817_v52 = vsel %vm816_vm15, %v813_v55, %v815_v58  ;;  %v818_v54 = vsel %vm816_vm15, %v815_v58, %v813_v55 }
 0x2fe   : > { %v824_v56 = vsel %vm811_vm0, %v818_v54, 0.0  ;;  %v825_v57 = vadd.f32 %v817_v52, %v808_v53 }
 0x2ff   : > { %v826_v60 = vadd.f32 %v824_v56, %v809_v59 }
 0x300   : > { %829 = vst [vmem:[%s1383_s8 + $0x10] sm:$0xff] %v825_v57 }
 0x301   : > { %830 = vst [vmem:[%s1383_s8 + $0x18] sm:$0xff] %v826_v60 }
 0x302   : > { %1200 = shalt.err (!%p1197_p4)
}
 0x303   : > { %s1246_s11 = smov 256  }
 0x304   : > { %1050 = dma.vmem_to_hbm [thread:$0]  (%p1332_p11), %s845_s29, 512, %s847_s12, %s832_s25, %s1246_s11, %s1246_s11, %s1244_s18  }
 0x305 PF: > { %s861_s8 = sand.u32 1, %s1227_s21   ;;  %p1652_p7 = scmp.ge.s32.totalorder %s1239_s24, 2 }
 0x306   : > { %s862_s19 = scalar_lea.sflag [#allocation4], %s861_s8 }
 0x307   : > { %p1057_p5 = pnand %p1652_p7, %p1336_p12 }
 0x309   : > { %p1058_p8 = pneg %p1057_p5 }
 0x30b   : > { %1222 = dma.done.wait (%p1058_p8), %s862_s19, 512  }
 0x30c   : > { %1224 = vsyncadd (%p1058_p8), %s862_s19, 4294966784  ;;  %p19_p10 = scmp.ge.s32.totalorder %s1307_s27, 4   ;;  %s1653_s21 = smov %s1231_s22 }
 0x30d   : > { %s1654_s22 = smov %s1235_s23  ;;  %s1655_s23 = smov %s1319_s30 }
 0x30e   : > { %s1656_s24 = smov %s1307_s27  ;;  %21 = sbr.rel (!%p19_p10) target bundleno = 5 (0x5), region = 97 }
 0x313   :  { %868 = vsyncpa [#allocation3], 1 }
 0x314   :  { %870 = vsyncpa [#allocation3 + $0x1], 1 }
 0x315   :  { %871 = vsyncpa [#allocation4], 1 }
 0x316   :  { %873 = vsyncpa [#allocation4 + $0x1], 1 }

</bundles_post_ra>
